<compile_context>
chip_gen: v6e
topology: v6e:2x2x1
jax: 0.10.0
libtpu: 0.0.40
codegen_flags: <defaults>
</compile_context>

<pallas_src>
import functools

import jax
import jax.numpy as jnp
from jax import lax
from jax.experimental import pallas as pl
from jax.experimental.pallas import tpu as pltpu


def _dice_kernel(logits_ref, targets_ref, inter_ref, psum_ref, tsum_ref,
                 *, hw_valid, tile, n_full_tiles, needs_mask, compute_dtype):
    """One (batch b, spatial-split s, spatial-tile h) grid step.

    logits_ref : (1, C, T)  native float dtype (f32 / bf16)
    targets_ref: (1, 1, T)  any integer dtype (int8/uint8/int16/int32)
    inter/psum/tsum_ref : (1, 1, C, 1) f32 outputs used directly as resident
        accumulators (init at h == 0; HBM writeback when the (b, s) block
        changes).
    """
    s = pl.program_id(1)
    h = pl.program_id(2)
    n_hw = pl.num_programs(2)

    @pl.when(h == 0)
    def _init():
        inter_ref[...] = jnp.zeros_like(inter_ref)
        psum_ref[...] = jnp.zeros_like(psum_ref)
        tsum_ref[...] = jnp.zeros_like(tsum_ref)

    x = logits_ref[0].astype(compute_dtype)       # (C, T), cast after HBM load
    t = targets_ref[0].astype(jnp.int32)          # (1, T), narrow -> i32 in-kernel
    C, T = x.shape

    # per-pixel softmax over the class (sublane) axis == F.softmax(inputs, dim=1)
    m = jnp.max(x, axis=0, keepdims=True)                           # (1, T)
    e = jnp.exp(x - m)                                              # (C, T)
    denom = jnp.sum(e, axis=0, keepdims=True, dtype=jnp.float32)    # (1, T) f32
    inv = pl.reciprocal(denom, approx=True)                         # EUP slot
    p = e * inv.astype(compute_dtype)                               # (C, T)

    # Implicit one-hot: class-id iota vs integer target (no (C,T) f32 one-hot
    # temp).  NOTE: targets >= num_classes yield an all-zero one-hot row (like
    # jax.nn.one_hot); PyTorch's F.one_hot would raise instead.
    class_ids = lax.broadcasted_iota(jnp.int32, (C, T), 0)
    cls_mask = class_ids == t                                       # (C, T) bool

    def _accumulate(p_, mask_):
        # NOTE: these lane reductions could be offloaded to the idle MXU
        # (p @ ones(T,1)) if a bundle dump shows the VALU slot saturated.
        inter_ref[0, 0] += jnp.sum(jnp.where(mask_, p_, 0), axis=1,
                                   keepdims=True, dtype=jnp.float32)
        psum_ref[0, 0] += jnp.sum(p_, axis=1, keepdims=True, dtype=jnp.float32)
        tsum_ref[0, 0] += jnp.sum(mask_.astype(jnp.float32), axis=1,
                                  keepdims=True)

    if needs_mask:
        # Ragged H*W: only trailing tiles pay the lane-validity mask; interior
        # tiles take the unmasked fast path (the cold pl.when branch is skipped
        # at runtime).
        g = s * n_hw + h                         # global spatial-tile index

        @pl.when(g < n_full_tiles)
        def _fast():
            _accumulate(p, cls_mask)

        @pl.when(g >= n_full_tiles)
        def _ragged():
            pos = g * tile + lax.broadcasted_iota(jnp.int32, (1, T), 1)
            valid = pos < hw_valid               # garbage OOB lanes -> off
            _accumulate(jnp.where(valid, p, 0),
                        jnp.logical_and(cls_mask, valid))
    else:
        _accumulate(p, cls_mask)


def _pick_compute_dtype(logits_dtype):
    """bf16 elementwise math only where the VPU/EUP are bf16-native (v6e/v7x)
    and the data already arrives as bf16; f32 everywhere else (incl. v5e)."""
    if jnp.dtype(logits_dtype) != jnp.dtype(jnp.bfloat16):
        return jnp.float32
    try:
        kind = jax.devices()[0].device_kind.lower()
    except Exception:
        kind = ""
    return jnp.bfloat16 if ("v6" in kind or "v7" in kind) else jnp.float32


def dice_loss(logits, targets, num_classes, smooth=1.0, tile_hw=None,
              spatial_splits=None, compute_dtype=None):
    """Pallas equivalent of DiceLoss(num_classes)(logits, targets, smooth).

    logits : (B, C, H, W) floats, shipped over HBM in their native dtype.
    targets: (B, H, W) integer class ids.  Narrow dtypes (int8/uint8/int16)
             are passed straight through (4x less target HBM traffic) and cast
             to i32 in-kernel.  Labels must be < num_classes (out-of-range
             labels silently give an all-zero one-hot row; F.one_hot raises).
    """
    B, C, H, W = logits.shape
    assert C == num_classes
    assert targets.shape == (B, H, W)
    HW = H * W

    x = logits.reshape(B, C, HW)
    if not jnp.issubdtype(targets.dtype, jnp.integer):
        targets = targets.astype(jnp.int32)
    t = targets.reshape(B, 1, HW)

    if compute_dtype is None:
        compute_dtype = _pick_compute_dtype(x.dtype)

    # ---- spatial tiling -----------------------------------------------------
    if tile_hw is None:
        # ~1 MiB f32-equivalent (C, tile) slab: flat part of the HBM-roofline
        # curve, and the live set (double-buffered inputs + a few (C, T)
        # temporaries) stays well inside v5e's 16 MiB default scoped VMEM.
        tile_hw = (1 << 20) // (C * 4)
    tile_hw = max(128, (tile_hw // 128) * 128)          # lane multiple
    tile_hw = min(tile_hw, pl.cdiv(HW, 128) * 128)      # never exceed padded HW

    hw_blocks = pl.cdiv(HW, tile_hw)     # number of (possibly ragged) tiles
    n_full = HW // tile_hw               # tiles with no out-of-bounds lanes

    # Optional spatial split so both TensorCores get work when B is small.
    if spatial_splits is None:
        spatial_splits = 2 if B == 1 else 1
    S = max(1, min(int(spatial_splits), hw_blocks))
    n_hw = pl.cdiv(hw_blocks, S)
    needs_mask = (S * n_hw) > n_full     # any tile with ragged / OOB lanes?
    clamp = (S * n_hw) > hw_blocks       # fully-OOB trailing tiles exist?

    def _hw_block(s, h):
        g = s * n_hw + h
        # Fully-out-of-range trailing tiles are clamped onto the last real
        # block; their contribution is zeroed by the in-kernel validity mask.
        return jnp.minimum(g, hw_blocks - 1) if clamp else g

    # ---- VMEM budget: double-buffered inputs + ~6 (C, tile) f32-sized temps --
    in_bytes = (C * tile_hw * jnp.dtype(x.dtype).itemsize
                + tile_hw * jnp.dtype(t.dtype).itemsize)
    temp_bytes = 6 * C * tile_hw * 4
    vmem_limit = int(min(max(2 * in_bytes + temp_bytes + (2 << 20), 8 << 20),
                         32 << 20))

    kernel = functools.partial(
        _dice_kernel, hw_valid=HW, tile=tile_hw, n_full_tiles=n_full,
        needs_mask=needs_mask, compute_dtype=compute_dtype)

    acc_shape = jax.ShapeDtypeStruct((B, S, C, 1), jnp.float32)
    acc_spec = pl.BlockSpec((1, 1, C, 1), lambda b, s, h: (b, s, 0, 0))

    call = pl.pallas_call(
        kernel,
        out_shape=(acc_shape, acc_shape, acc_shape),      # inter, psum, tsum
        grid_spec=pltpu.PrefetchScalarGridSpec(
            num_scalar_prefetch=0,
            grid=(B, S, n_hw),                            # reduction axis last
            in_specs=[
                pl.BlockSpec((1, C, tile_hw),
                             lambda b, s, h: (b, 0, _hw_block(s, h))),
                pl.BlockSpec((1, 1, tile_hw),
                             lambda b, s, h: (b, 0, _hw_block(s, h))),
            ],
            out_specs=(acc_spec, acc_spec, acc_spec),
        ),
        compiler_params=pltpu.CompilerParams(
            # TODO(synk): on v7x with B == 1, mark the split axis
            # pltpu.CORE_PARALLEL so both TensorCores share one image.
            dimension_semantics=("parallel", "parallel", "arbitrary"),
            vmem_limit_bytes=vmem_limit),
    )

    try:
        inter, psum, tsum = call(x, t)
    except Exception:
        if t.dtype == jnp.int32:
            raise
        # Some Mosaic versions reject sub-32-bit blocks with a unit sublane
        # dim; retry with i32 targets instead of failing outright.
        inter, psum, tsum = call(x, t.astype(jnp.int32))

    # tiny (B, C) glue: combine spatial splits and apply the dice formula
    inter = jnp.sum(inter[..., 0], axis=1)
    psum = jnp.sum(psum[..., 0], axis=1)
    tsum = jnp.sum(tsum[..., 0], axis=1)
    dice = (2.0 * inter + smooth) / (psum + tsum + smooth)
    return 1.0 - jnp.mean(dice)


def _reference_dice_loss(logits, targets, num_classes, smooth=1.0):
    # Pure-JAX reference mirroring the PyTorch module.
    p = jax.nn.softmax(logits.astype(jnp.float32), axis=1)
    onehot = jax.nn.one_hot(targets, num_classes, dtype=jnp.float32)   # (B,H,W,C)
    onehot = jnp.transpose(onehot, (0, 3, 1, 2))                       # (B,C,H,W)
    inter = jnp.sum(p * onehot, axis=(2, 3))
    dice = (2.0 * inter + smooth) / (jnp.sum(p, axis=(2, 3)) +
                                     jnp.sum(onehot, axis=(2, 3)) + smooth)
    return 1.0 - jnp.mean(dice)


if __name__ == "__main__":
    key = jax.random.PRNGKey(0)
    k1, k2 = jax.random.split(key)

    # 1) canonical shapes from the module: B=2, C=4, 16x16, f32 logits, i32 targets.
    B, C, H, W = 2, 4, 16, 16
    logits = jax.random.normal(k1, (B, C, H, W), dtype=jnp.float32)
    targets = jax.random.randint(k2, (B, H, W), 0, C, dtype=jnp.int32)
    loss = jax.block_until_ready(dice_loss(logits, targets, num_classes=C, smooth=1.0))
    ref = _reference_dice_loss(logits, targets, C, smooth=1.0)
    assert jnp.allclose(loss, ref, atol=1e-3, rtol=1e-3), (loss, ref)

    # 2) ragged H*W (130 -> two 128-lane tiles, last one partial) with int8
    #    targets: exercises the un-padded non-dividing last block, the
    #    pl.when-gated lane mask, and the narrow target stream.
    H2, W2 = 10, 13
    logits2 = jax.random.normal(k1, (B, C, H2, W2), dtype=jnp.float32)
    targets2 = jax.random.randint(k2, (B, H2, W2), 0, C, dtype=jnp.int32)
    loss2 = jax.block_until_ready(
        dice_loss(logits2, targets2.astype(jnp.int8), num_classes=C,
                  smooth=1.0, tile_hw=128))
    ref2 = _reference_dice_loss(logits2, targets2, C, smooth=1.0)
    assert jnp.allclose(loss2, ref2, atol=1e-3, rtol=1e-3), (loss2, ref2)

    # 3) B == 1 with a 2-way spatial split (keeps both v7x TensorCores busy)
    #    and bf16 logits (bf16 elementwise math on v6e/v7x, f32 elsewhere).
    logits3 = jax.random.normal(k1, (1, C, H, W), dtype=jnp.bfloat16)
    targets3 = jax.random.randint(k2, (1, H, W), 0, C, dtype=jnp.int32)
    loss3 = jax.block_until_ready(
        dice_loss(logits3, targets3.astype(jnp.uint8), num_classes=C,
                  smooth=1.0, tile_hw=128, spatial_splits=2))
    ref3 = _reference_dice_loss(logits3, targets3, C, smooth=1.0)
    assert jnp.allclose(loss3, ref3, atol=2e-2, rtol=2e-2), (loss3, ref3)

    print("KERNEL_OK")
</pallas_src>

<mosaic_0001>
module attributes {stable_mosaic.version = 11 : i64} {
  func.func @_dice_kernel(%arg0: i32, %arg1: i32, %arg2: i32, %arg3: memref<1x4x256xf32, #tpu.memory_space<vmem>>, %arg4: memref<1x1x256xi32, #tpu.memory_space<vmem>>, %arg5: memref<1x1x4x1xf32, #tpu.memory_space<vmem>>, %arg6: memref<1x1x4x1xf32, #tpu.memory_space<vmem>>, %arg7: memref<1x1x4x1xf32, #tpu.memory_space<vmem>>) attributes {dimension_semantics = [#tpu.dimension_semantics<parallel>, #tpu.dimension_semantics<parallel>, #tpu.dimension_semantics<arbitrary>], iteration_bounds = array<i64: 2, 1, 1>, scalar_prefetch = 0 : i64, scratch_operands = 0 : i64, tpu.core_type = #tpu.core_type<tc>, window_params = [{transform_indices = @transform_0, window_bounds = array<i64: 1, 4, 256>}, {transform_indices = @transform_1, window_bounds = array<i64: 1, 1, 256>}, {transform_indices = @transform_2, window_bounds = array<i64: 1, 1, 4, 1>}, {transform_indices = @transform_3, window_bounds = array<i64: 1, 1, 4, 1>}, {transform_indices = @transform_4, window_bounds = array<i64: 1, 1, 4, 1>}]} {
    %c0_i32 = arith.constant 0 : i32
    %0 = arith.cmpi eq, %arg2, %c0_i32 : i32
    %1 = arith.extui %0 : i1 to i32
    %c0_i32_0 = arith.constant 0 : i32
    %2 = arith.cmpi ne, %1, %c0_i32_0 : i32
    scf.if %2 {
      %cst_35 = arith.constant 0.000000e+00 : f32
      %49 = vector.broadcast %cst_35 : f32 to vector<1x1x4x1xf32>
      %c0_36 = arith.constant 0 : index
      %c0_37 = arith.constant 0 : index
      %c0_38 = arith.constant 0 : index
      %c0_39 = arith.constant 0 : index
      %50 = vector.load %arg5[%c0_36, %c0_37, %c0_38, %c0_39] : memref<1x1x4x1xf32, #tpu.memory_space<vmem>>, vector<1x1x4x1xf32>
      tpu.vector_store %arg5[%c0_36, %c0_37, %c0_38, %c0_39], %49 {strides = array<i32>} : memref<1x1x4x1xf32, #tpu.memory_space<vmem>>, vector<1x1x4x1xf32>,
      %cst_40 = arith.constant 0.000000e+00 : f32
      %51 = vector.broadcast %cst_40 : f32 to vector<1x1x4x1xf32>
      %c0_41 = arith.constant 0 : index
      %c0_42 = arith.constant 0 : index
      %c0_43 = arith.constant 0 : index
      %c0_44 = arith.constant 0 : index
      %52 = vector.load %arg6[%c0_41, %c0_42, %c0_43, %c0_44] : memref<1x1x4x1xf32, #tpu.memory_space<vmem>>, vector<1x1x4x1xf32>
      tpu.vector_store %arg6[%c0_41, %c0_42, %c0_43, %c0_44], %51 {strides = array<i32>} : memref<1x1x4x1xf32, #tpu.memory_space<vmem>>, vector<1x1x4x1xf32>,
      %cst_45 = arith.constant 0.000000e+00 : f32
      %53 = vector.broadcast %cst_45 : f32 to vector<1x1x4x1xf32>
      %c0_46 = arith.constant 0 : index
      %c0_47 = arith.constant 0 : index
      %c0_48 = arith.constant 0 : index
      %c0_49 = arith.constant 0 : index
      %54 = vector.load %arg7[%c0_46, %c0_47, %c0_48, %c0_49] : memref<1x1x4x1xf32, #tpu.memory_space<vmem>>, vector<1x1x4x1xf32>
      tpu.vector_store %arg7[%c0_46, %c0_47, %c0_48, %c0_49], %53 {strides = array<i32>} : memref<1x1x4x1xf32, #tpu.memory_space<vmem>>, vector<1x1x4x1xf32>,
    } else {
    }
    %c0 = arith.constant 0 : index
    %c0_1 = arith.constant 0 : index
    %c0_2 = arith.constant 0 : index
    %3 = vector.load %arg3[%c0, %c0_1, %c0_2] : memref<1x4x256xf32, #tpu.memory_space<vmem>>, vector<1x4x256xf32>
    %4 = vector.shape_cast %3 : vector<1x4x256xf32> to vector<4x256xf32>
    %c0_3 = arith.constant 0 : index
    %c0_4 = arith.constant 0 : index
    %c0_5 = arith.constant 0 : index
    %5 = vector.load %arg4[%c0_3, %c0_4, %c0_5] : memref<1x1x256xi32, #tpu.memory_space<vmem>>, vector<1x1x256xi32>
    %6 = vector.shape_cast %5 : vector<1x1x256xi32> to vector<1x256xi32>
    %cst = arith.constant dense<0xFF800000> : vector<256xf32>
    %7 = vector.multi_reduction <maximumf>, %4, %cst [0] : vector<4x256xf32> to vector<256xf32>
    %8 = vector.shape_cast %7 : vector<256xf32> to vector<1x256xf32>
    %9 = vector.broadcast %8 : vector<1x256xf32> to vector<4x256xf32>
    %10 = arith.subf %4, %9 : vector<4x256xf32>
    %11 = math.exp %10 : vector<4x256xf32>
    %cst_6 = arith.constant dense<0.000000e+00> : vector<256xf32>
    %12 = vector.multi_reduction <add>, %11, %cst_6 [0] : vector<4x256xf32> to vector<256xf32>
    %13 = vector.shape_cast %12 : vector<256xf32> to vector<1x256xf32>
    %14 = tpu.reciprocal %13 {approx = true} : vector<1x256xf32> -> vector<1x256xf32>
    %15 = vector.broadcast %14 : vector<1x256xf32> to vector<4x256xf32>
    %16 = arith.mulf %11, %15 : vector<4x256xf32>
    %17 = tpu.iota {dimensions = array<i32: 0>} : vector<4x256xi32>
    %18 = vector.broadcast %6 : vector<1x256xi32> to vector<4x256xi32>
    %19 = arith.cmpi eq, %17, %18 : vector<4x256xi32>
    %c0_7 = arith.constant 0 : index
    %c0_8 = arith.constant 0 : index
    %c0_9 = arith.constant 0 : index
    %c0_10 = arith.constant 0 : index
    %20 = vector.load %arg5[%c0_7, %c0_8, %c0_9, %c0_10] : memref<1x1x4x1xf32, #tpu.memory_space<vmem>>, vector<1x1x4x1xf32>
    %21 = vector.shape_cast %20 : vector<1x1x4x1xf32> to vector<4x1xf32>
    %c0_i32_11 = arith.constant 0 : i32
    %22 = arith.sitofp %c0_i32_11 : i32 to f32
    %23 = vector.broadcast %22 : f32 to vector<4x256xf32>
    %24 = arith.select %19, %16, %23 : vector<4x256xi1>, vector<4x256xf32>
    %cst_12 = arith.constant dense<0.000000e+00> : vector<4xf32>
    %25 = vector.multi_reduction <add>, %24, %cst_12 [1] : vector<4x256xf32> to vector<4xf32>
    %26 = vector.shape_cast %25 : vector<4xf32> to vector<4x1xf32>
    %27 = arith.addf %21, %26 : vector<4x1xf32>
    %c0_13 = arith.constant 0 : index
    %c0_14 = arith.constant 0 : index
    %c0_15 = arith.constant 0 : index
    %c0_16 = arith.constant 0 : index
    %28 = vector.load %arg5[%c0_13, %c0_14, %c0_15, %c0_16] : memref<1x1x4x1xf32, #tpu.memory_space<vmem>>, vector<1x1x4x1xf32>
    %29 = vector.shape_cast %28 : vector<1x1x4x1xf32> to vector<4x1xf32>
    %30 = vector.shape_cast %27 : vector<4x1xf32> to vector<1x1x4x1xf32>
    tpu.vector_store %arg5[%c0_13, %c0_14, %c0_15, %c0_16], %30 {strides = array<i32>} : memref<1x1x4x1xf32, #tpu.memory_space<vmem>>, vector<1x1x4x1xf32>,
    %c0_17 = arith.constant 0 : index
    %c0_18 = arith.constant 0 : index
    %c0_19 = arith.constant 0 : index
    %c0_20 = arith.constant 0 : index
    %31 = vector.load %arg6[%c0_17, %c0_18, %c0_19, %c0_20] : memref<1x1x4x1xf32, #tpu.memory_space<vmem>>, vector<1x1x4x1xf32>
    %32 = vector.shape_cast %31 : vector<1x1x4x1xf32> to vector<4x1xf32>
    %cst_21 = arith.constant dense<0.000000e+00> : vector<4xf32>
    %33 = vector.multi_reduction <add>, %16, %cst_21 [1] : vector<4x256xf32> to vector<4xf32>
    %34 = vector.shape_cast %33 : vector<4xf32> to vector<4x1xf32>
    %35 = arith.addf %32, %34 : vector<4x1xf32>
    %c0_22 = arith.constant 0 : index
    %c0_23 = arith.constant 0 : index
    %c0_24 = arith.constant 0 : index
    %c0_25 = arith.constant 0 : index
    %36 = vector.load %arg6[%c0_22, %c0_23, %c0_24, %c0_25] : memref<1x1x4x1xf32, #tpu.memory_space<vmem>>, vector<1x1x4x1xf32>
    %37 = vector.shape_cast %36 : vector<1x1x4x1xf32> to vector<4x1xf32>
    %38 = vector.shape_cast %35 : vector<4x1xf32> to vector<1x1x4x1xf32>
    tpu.vector_store %arg6[%c0_22, %c0_23, %c0_24, %c0_25], %38 {strides = array<i32>} : memref<1x1x4x1xf32, #tpu.memory_space<vmem>>, vector<1x1x4x1xf32>,
    %c0_26 = arith.constant 0 : index
    %c0_27 = arith.constant 0 : index
    %c0_28 = arith.constant 0 : index
    %c0_29 = arith.constant 0 : index
    %39 = vector.load %arg7[%c0_26, %c0_27, %c0_28, %c0_29] : memref<1x1x4x1xf32, #tpu.memory_space<vmem>>, vector<1x1x4x1xf32>
    %40 = vector.shape_cast %39 : vector<1x1x4x1xf32> to vector<4x1xf32>
    %41 = arith.extui %19 : vector<4x256xi1> to vector<4x256xi32>
    %42 = arith.sitofp %41 : vector<4x256xi32> to vector<4x256xf32>
    %cst_30 = arith.constant dense<0.000000e+00> : vector<4xf32>
    %43 = vector.multi_reduction <add>, %42, %cst_30 [1] : vector<4x256xf32> to vector<4xf32>
    %44 = vector.shape_cast %43 : vector<4xf32> to vector<4x1xf32>
    %45 = arith.addf %40, %44 : vector<4x1xf32>
    %c0_31 = arith.constant 0 : index
    %c0_32 = arith.constant 0 : index
    %c0_33 = arith.constant 0 : index
    %c0_34 = arith.constant 0 : index
    %46 = vector.load %arg7[%c0_31, %c0_32, %c0_33, %c0_34] : memref<1x1x4x1xf32, #tpu.memory_space<vmem>>, vector<1x1x4x1xf32>
    %47 = vector.shape_cast %46 : vector<1x1x4x1xf32> to vector<4x1xf32>
    %48 = vector.shape_cast %45 : vector<4x1xf32> to vector<1x1x4x1xf32>
    tpu.vector_store %arg7[%c0_31, %c0_32, %c0_33, %c0_34], %48 {strides = array<i32>} : memref<1x1x4x1xf32, #tpu.memory_space<vmem>>, vector<1x1x4x1xf32>,
    return
  }
  func.func @transform_0(%arg0: i32, %arg1: i32, %arg2: i32) -> (i32, i32, i32) {
    %c1_i32 = arith.constant 1 : i32
    %0 = arith.muli %arg1, %c1_i32 : i32
    %1 = arith.addi %0, %arg2 : i32
    %c0_i32 = arith.constant 0 : i32
    %c0_i32_0 = arith.constant 0 : i32
    return %arg0, %c0_i32, %1 : i32, i32, i32
  }
  func.func @transform_1(%arg0: i32, %arg1: i32, %arg2: i32) -> (i32, i32, i32) {
    %c1_i32 = arith.constant 1 : i32
    %0 = arith.muli %arg1, %c1_i32 : i32
    %1 = arith.addi %0, %arg2 : i32
    %c0_i32 = arith.constant 0 : i32
    %c0_i32_0 = arith.constant 0 : i32
    return %arg0, %c0_i32, %1 : i32, i32, i32
  }
  func.func @transform_2(%arg0: i32, %arg1: i32, %arg2: i32) -> (i32, i32, i32, i32) {
    %c0_i32 = arith.constant 0 : i32
    %c0_i32_0 = arith.constant 0 : i32
    %c0_i32_1 = arith.constant 0 : i32
    return %arg0, %arg1, %c0_i32, %c0_i32_0 : i32, i32, i32, i32
  }
  func.func @transform_3(%arg0: i32, %arg1: i32, %arg2: i32) -> (i32, i32, i32, i32) {
    %c0_i32 = arith.constant 0 : i32
    %c0_i32_0 = arith.constant 0 : i32
    %c0_i32_1 = arith.constant 0 : i32
    return %arg0, %arg1, %c0_i32, %c0_i32_0 : i32, i32, i32, i32
  }
  func.func @transform_4(%arg0: i32, %arg1: i32, %arg2: i32) -> (i32, i32, i32, i32) {
    %c0_i32 = arith.constant 0 : i32
    %c0_i32_0 = arith.constant 0 : i32
    %c0_i32_1 = arith.constant 0 : i32
    return %arg0, %arg1, %c0_i32, %c0_i32_0 : i32, i32, i32, i32
  }
}

</mosaic_0001>

<bundles_post_ra>
// kernel: tpu_custom_call.1
= control target key start
LH: loop header
LB: loop body
LE: loop exit
PB: predicated region body
PF: predicated region fallthrough
CT: control target
= control target key end

     0   :  { %10 = vsyncpa [#allocation3], 0  ;;  %s1047_s0 = inlined_call_operand.hbm [shape: f32[2,4,256], index: 0, kind: input, shape index: {}]   ;;  %s1048_s1 = inlined_call_operand.hbm [shape: s32[2,1,256], index: 1, kind: input, shape index: {}]   ;;  %s1049_s2 = inlined_call_operand.vmem [shape: f32[2,1,4,1], index: 2, kind: output, shape index: {0}]   ;;  %s1050_s3 = inlined_call_operand.vmem [shape: f32[2,1,4,1], index: 3, kind: output, shape index: {1}]   ;;  %s1051_s4 = inlined_call_operand.vmem [shape: f32[2,1,4,1], index: 4, kind: output, shape index: {2}]  }
   0x1   :  { %12 = vsyncpa [#allocation3 + $0x1], 0 }
   0x2   :  { %13 = vsyncpa [#allocation5], 0 }
   0x3   :  { %15 = vsyncpa [#allocation5 + $0x1], 0  ;;  %s868_s15 = smov 0   ;;  %s870_s16 = smov 0  }
   0x4   :  { %s872_s17 = smov 0   ;;  %s874_s18 = smov 0  }
   0x5   :  { %s876_s19 = smov 0   ;;  %s878_s20 = smov 0  }
   0x6 LB: > { %s638_s21 = sadd.s32 4294967295, %s838_s20   ;;  %s40_s22 = sadd.s32 1, %s834_s19  ;;  %s838_s20 = sphi %s878_s20, %s21_s20   ;;  %s834_s19 = sphi %s876_s19, %s1060_s19   ;;  %s830_s18 = sphi %s874_s18, %s1059_s18   ;;  %s826_s17 = sphi %s872_s17, %s1058_s17   ;;  %s822_s16 = sphi %s870_s16, %s1057_s16   ;;  %s818_s15 = sphi %s868_s15, %s1056_s15  }
   0x7   : > { %p42_p0 = scmp.ge.s32.totalorder %s40_s22, 2  ;;  %s51_s23 = sadd.s32 1, %s826_s17 }
   0x8   : > { %p58_p1 = scmp.ne.s32.totalorder %s826_s17, %s822_s16  ;;  %p59_p2 = scmp.eq.s32.totalorder %s838_s20, 0 }
   0x9   : > { %s1062_s22 = smov (%p42_p0, %s40_s22), 0  ;;  %p64_p4 = scmp.ne.s32.totalorder %s822_s16, %s818_s15 }
   0xa   : > { %p904_p3 = por %p59_p2, %p58_p1  ;;  %s46_s25 = ssub.s32 %s834_s19, %s1062_s22 }
   0xb   : > { %p65_p5 = scmp.eq.s32.totalorder %s638_s21, 0  ;;  %p49_p6 = scmp.eq.s32.totalorder %s46_s25, 0 }
   0xc   : > { %p671_p8 = scmp.lt.s32.totalorder %s838_s20, 2  ;;  %s920_s28 = sand.u32 1, %s826_s17  }
   0xd   : > { %p911_p7 = por %p65_p5, %p64_p4  ;;  %s658_s29 = sshll.u32 %s834_s19, 7 }
   0xe   : > { %s917_s27 = scalar_select %p49_p6, %s826_s17, %s51_s23  }
   0xf   : > { %s642_s30 = sshll.u32 %s920_s28, 3  ;;  %s215_s7 = scalar_lea.hbm %s1047_s0, %s658_s29 }
  0x10   : > { %s206_s8 = scalar_lea.vmem [#allocation2], %s642_s30  ;;  %p929_p9 = pnand %p671_p8, %p904_p3 }
  0x11   : > { %s217_s9 = sshll.u32 %s206_s8, 4  ;;  %p648_p10 = scmp.ge.s32.totalorder %s838_s20, 1  ;;  %s218_s9 = int_to_ptr.vmem [resolvable:$true] %s217_s9 }
  0x12   : > { %p244_p11 = scmp.lt.s32.totalorder %s838_s20, 3  ;;  %s203_s11 = scalar_lea.sflag [#allocation3], %s920_s28 }
  0x13   : > { %p730_p12 = pneg %p929_p9  ;;  %s741_s12 = scalar_lea.vmem %s218_s9, 128 }
  0x14   : > { %p742_p13 = scmp.ne.s32.totalorder %s218_s9, %s741_s12  ;;  %s840_s13 = smov [#allocation2]  }
  0x15   : > { %s746_s14 = sshll.u32 %s840_s13, 4  ;;  %s747_s14 = int_to_ptr.vmem [resolvable:$false] %s746_s14 }
  0x16   : > { %p744_p0 = pnand %p742_p13, %p730_p12  ;;  %s748_s15 = scalar_lea.vmem %s747_s14, 256 }
  0x17   : > { %p749_p2 = scmp.lt.s32.totalorder %s218_s9, %s747_s14  ;;  %p750_p3 = scmp.lt.s32.totalorder %s748_s15, %s741_s12 }
  0x18   : > { %p745_p1 = pneg %p744_p0 }
  0x19   : > { %p751_p4 = por %p750_p3, %p749_p2 }
  0x1b   : > { %p752_p5 = pnand %p751_p4, %p745_p1 }
  0x1d   : > { %755 = shalt.err (!%p752_p5)
}
  0x1e   : > { %667 = dma.hbm_to_vmem [thread:$0]  (!%p929_p9), %s215_s7, 128, %s218_s9, %s203_s11  }
  0x1f   : > { %p947_p6 = pnand %p648_p10, %p244_p11  ;;  %s645_s23 = sshll.u32 %s920_s28, 1 }
  0x20   : > { %s659_s24 = sshll.u32 %s834_s19, 5  ;;  %s228_s5 = scalar_lea.vmem [#allocation4], %s645_s23 }
  0x21   : > { %s237_s30 = scalar_lea.hbm %s1048_s1, %s659_s24  ;;  %s239_s6 = sshll.u32 %s228_s5, 4  ;;  %s240_s6 = int_to_ptr.vmem [resolvable:$true] %s239_s6 }
  0x22   : > { %s225_s8 = scalar_lea.sflag [#allocation5], %s920_s28  ;;  %s769_s12 = scalar_lea.vmem %s240_s6, 32 }
  0x23   : > { %p770_p8 = scmp.ne.s32.totalorder %s240_s6, %s769_s12  ;;  %s841_s7 = smov [#allocation4]  }
  0x24   : > { %s774_s9 = sshll.u32 %s841_s7, 4  ;;  %s775_s9 = int_to_ptr.vmem [resolvable:$false] %s774_s9 }
  0x25   : > { %p772_p13 = pnand %p770_p8, %p730_p12  ;;  %s776_s11 = scalar_lea.vmem %s775_s9, 64 }
  0x26   : > { %p777_p10 = scmp.lt.s32.totalorder %s240_s6, %s775_s9  ;;  %p778_p11 = scmp.lt.s32.totalorder %s776_s11, %s769_s12 }
  0x27   : > { %p773_p0 = pneg %p772_p13 }
  0x28   : > { %p779_p1 = por %p778_p11, %p777_p10 }
  0x2a   : > { %p780_p2 = pnand %p779_p1, %p773_p0 }
  0x2c   : > { %783 = shalt.err (!%p780_p2)
}
  0x2d   : > { %670 = dma.hbm_to_vmem [thread:$0]  (!%p929_p9), %s237_s30, 32, %s240_s6, %s225_s8  }
  0x2e   : > { %248 = sbr.rel (%p947_p6) target bundleno = 275 (0x113), region = 28  ;;  %s250_s28 = sand.u32 (!%p947_p6), 1, %s822_s16  }
  0x2f   : > { %s649_s13 = sshll.u32 (!%p947_p6), %s250_s28, 3  ;;  %s251_s14 = scalar_lea.sflag (!%p947_p6), [#allocation3], %s250_s28 }
  0x30   : > { %s254_s15 = scalar_lea.vmem (!%p947_p6), [#allocation2], %s649_s13 }
  0x33   : > { %809 = dma.done.wait (%p911_p7), %s251_s14, 128  }
  0x34   : > { %811 = vsyncadd (%p911_p7), %s251_s14, 4294967168  ;;  %s650_s23 = sshll.u32 %s250_s28, 1  ;;  %s260_s24 = scalar_lea.sflag [#allocation5], %s250_s28 }
  0x35   : > { %s263_s25 = scalar_lea.vmem [#allocation4], %s650_s23 }
  0x36   : > { %813 = dma.done.wait (%p911_p7), %s260_s24, 32  }
  0x37   : > { %815 = vsyncadd (%p911_p7), %s260_s24, 4294967264  ;;  %v393_v0 = vlaneseq  ;;  %p313_p9 = scmp.lt.s32.totalorder %s830_s18, 1  ;;  %vm338_vm0 = vcmask 3072   ;;  %vm347_vm1 = vcmask 1043456   ;;  %v842_v4 = vmov 0.0   ;;  %v342_v5 = vld [vmem:[%s254_s15] sm:$0xff] }
  0x38   : > { %v343_v6 = vld [vmem:[%s263_s25] sm:$0x3]  ;;  %v345_v7 = vcombine.high %v342_v5, %v342_v5  ;;  %v348_v8 = vsel %vm347_vm1, %v342_v5, -inf }
  0x39   : > { %v974_v1 = vshrl.u32 %v393_v0, 7  ;;  %s1064_s18 = smov (!%p313_p9, %s830_s18), 1  ;;  %v349_v11 = vrot.slane %v348_v8, 4 }
  0x3a   : > { %s979_s10 = sshll.u32 %s1064_s18, 2  ;;  %v355_v12 = vsel %vm347_vm1, %v345_v7, -inf }
  0x3b   : > { %v397_v2 = vsub.s32 0, %v974_v1  ;;  %v401_v3 = vsub.s32 1, %v974_v1  ;;  %s985_s26 = scalar_lea.vmem %s1049_s2, %s979_s10  ;;  %v350_v13 = vmax.f32 %v348_v8, %v349_v11  ;;  %v356_v14 = vrot.slane %v355_v12, 4  ;;  %s333_s5 = scalar_lea.vmem %s1051_s4, %s979_s10 }
  0x3c   : > { %339 = vst.msk [vmem:[%s985_s26] sm:$0xf] %vm338_vm0, %v842_v4  ;;  %s326_s12 = scalar_lea.vmem %s1050_s3, %s979_s10  ;;  %341 = vst.msk [vmem:[%s333_s5] sm:$0xf] %vm338_vm0, %v842_v4 }
  0x3d   : > { %v398_v9 = vrot.slane %v343_v6, %v397_v2  ;;  %v402_v10 = vrot.slane %v343_v6, %v401_v3  ;;  %v351_v19 = vrot.slane %v350_v13, 2  ;;  %v357_v20 = vmax.f32 %v355_v12, %v356_v14  ;;  %340 = vst.msk [vmem:[%s326_s12] sm:$0xf] %vm338_vm0, %v842_v4 }
  0x3f   : > { %vm403_vm2 = vcmp.eq.s32.totalorder %v974_v1, %v398_v9  ;;  %vm404_vm3 = vcmp.eq.s32.totalorder %v974_v1, %v402_v10  ;;  %v352_v22 = vmax.f32 %v350_v13, %v351_v19  ;;  %v358_v23 = vrot.slane %v357_v20, 2 }
  0x40   : > { %v654_v15 = vsel %vm403_vm2, 1.0, %v842_v4  ;;  %v655_v16 = vsel %vm404_vm3, 1.0, %v842_v4 }
  0x41   : > { %v432_v17 = vsel %vm347_vm1, %v654_v15, 0.0  ;;  %v433_v18 = vsel %vm347_vm1, %v655_v16, 0.0  ;;  %v353_v24 = vrot.slane %v352_v22, 1  ;;  %v359_v25 = vmax.f32 %v357_v20, %v358_v23 }
  0x42   : > { %v434_v21 = vadd.f32 %v433_v18, %v432_v17 }
  0x43   : > { %v354_v26 = vmax.f32 %v352_v22, %v353_v24  ;;  %v360_v27 = vrot.slane %v359_v25, 1  ;;  %v427_v61 = vld [vmem:[%s333_s5] sm:$0xf] }
  0x44   : > { %435 = vadd.xlane.f32.xlu1 %v434_v21  ;;  %v405_v0 = vld [vmem:[%s985_s26] sm:$0xf] }
  0x45   : > { %v361_v28 = vmax.f32 %v359_v25, %v360_v27  ;;  %v419_v3 = vld [vmem:[%s326_s12] sm:$0xf] }
  0x47   : > { %v364_v29 = vcombine.low %v354_v26, %v361_v28 }
  0x49   : > { %v366_v30 = vsub.f32 %v342_v5, %v364_v29 }
  0x4b   : > { %v367_v31 = vmul.f32 1.442695, %v366_v30 }
  0x4d   : > { %722 = vpow2.f32 %v367_v31 }
  0x5a   : > { %v723_v32 = vpop.eup %722 }
  0x5b   : > { %v370_v33 = vcombine.high %v723_v32, %v723_v32  ;;  %v372_v34 = vsel %vm347_vm1, %v723_v32, 0.0 }
  0x5c   : > { %v373_v35 = vrot.slane %v372_v34, 4 }
  0x5d   : > { %v379_v36 = vsel %vm347_vm1, %v370_v33, 0.0 }
  0x5e   : > { %v374_v37 = vadd.f32 %v373_v35, %v372_v34  ;;  %v380_v38 = vrot.slane %v379_v36, 4 }
  0x60   : > { %v375_v39 = vrot.slane %v374_v37, 2  ;;  %v381_v40 = vadd.f32 %v380_v38, %v379_v36 }
  0x62   : > { %v376_v41 = vadd.f32 %v375_v39, %v374_v37  ;;  %v382_v42 = vrot.slane %v381_v40, 2 }
  0x64   : > { %v377_v43 = vrot.slane %v376_v41, 1  ;;  %v383_v44 = vadd.f32 %v382_v42, %v381_v40 }
  0x66   : > { %v378_v45 = vadd.f32 %v377_v43, %v376_v41  ;;  %v384_v46 = vrot.slane %v383_v44, 1 }
  0x68   : > { %v385_v47 = vadd.f32 %v384_v46, %v383_v44  ;;  %724 = vrcp.f32 %v378_v45 }
  0x6a   : > { %726 = vrcp.f32 %v385_v47 }
  0x75   : > { %v725_v48 = vpop.eup %724 }
  0x77   : > { %v727_v49 = vpop.eup %726 }
  0x78   : > { %v390_v50 = vcombine.low %v725_v48, %v727_v49 }
  0x7a   : > { %v392_v51 = vmul.f32 %v723_v32, %v390_v50 }
  0x7c   : > { %v407_v52 = vcombine.high %v392_v51, %v392_v51  ;;  %v409_v53 = vsel %vm403_vm2, %v392_v51, 0.0  ;;  %v420_v57 = vsel %vm347_vm1, %v392_v51, 0.0 }
  0x7d   : > { %v411_v54 = vsel %vm347_vm1, %v409_v53, 0.0 }
  0x7e   : > { %v410_v55 = vsel %vm404_vm3, %v407_v52, 0.0  ;;  %v421_v58 = vsel %vm347_vm1, %v407_v52, 0.0 }
  0x7f   : > { %v412_v56 = vsel %vm347_vm1, %v410_v55, 0.0  ;;  %v422_v60 = vadd.f32 %v421_v58, %v420_v57 }
  0x80   : > { %v413_v59 = vadd.f32 %v412_v56, %v411_v54 }
  0x82   : > { %414 = vadd.xlane.f32.xlu0 %v413_v59 }
  0x86   : > { %423 = vadd.xlane.f32.xlu0 %v422_v60 }
  0xcd   : > { %v436_v62 = vpop.xlane.xlu1 %435 }
  0xce   : > { %v437_v63 = vadd.f32 %v436_v62, %v427_v61 }
  0xd0   : > { %438 = vst.msk [vmem:[%s333_s5] sm:$0xf] %vm338_vm0, %v437_v63 }
 0x10b   : > { %v415_v1 = vpop.xlane.xlu0 %414 }
 0x10c   : > { %v416_v2 = vadd.f32 %v415_v1, %v405_v0 }
 0x10e   : > { %418 = vst.msk [vmem:[%s985_s26] sm:$0xf] %vm338_vm0, %v416_v2 }
 0x10f   : > { %v424_v5 = vpop.xlane.xlu0 %423 }
 0x110   : > { %v425_v6 = vadd.f32 %v424_v5, %v419_v3 }
 0x112   : > { %426 = vst.msk [vmem:[%s326_s12] sm:$0xf] %vm338_vm0, %v425_v6 }
 0x113 PF: > { %s21_s20 = sadd.s32 1, %s838_s20   ;;  %s1056_s15 = smov %s822_s16 }
 0x114   : > { %p18_p7 = scmp.ge.s32.totalorder %s21_s20, 4   ;;  %s1057_s16 = smov %s826_s17 }
 0x115   : > { %s1058_s17 = smov %s917_s27  ;;  %s1059_s18 = smov %s834_s19 }
 0x116   : > { %s1060_s19 = smov %s1062_s22  ;;  %20 = sbr.rel (!%p18_p7) target bundleno = 6 (0x6), region = 109 }
 0x11b   :  { %504 = vsyncpa [#allocation3], 1 }
 0x11c   :  { %506 = vsyncpa [#allocation3 + $0x1], 1 }
 0x11d   :  { %507 = vsyncpa [#allocation5], 1 }
 0x11e   :  { %509 = vsyncpa [#allocation5 + $0x1], 1 }

</bundles_post_ra>
